<compile_context>
chip_gen: v7x
topology: tpu7x:2x2x1
jax: 0.10.0
libtpu: 0.0.40
codegen_flags: <defaults>
</compile_context>

<pallas_src>
import functools

import jax
import jax.numpy as jnp
from jax.experimental import pallas as pl
from jax.experimental.pallas import tpu as pltpu

NEG_SLOPE = 0.01  # nn.LeakyReLU default


def _leaky_relu(x):
    return jnp.where(x > 0, x, NEG_SLOPE * x)


def _round_up(x, m):
    return (x + m - 1) // m * m


def _cdiv(a, b):
    return (a + b - 1) // b


def _vmem_cap_bytes():
    # Generation-aware physical VMEM (v5e/v6e: 128 MiB, v7x: 64 MiB per TC).
    try:
        return int(pltpu.get_tpu_info().vmem_capacity_bytes)
    except Exception:
        return 64 * 2**20  # conservative fallback that fits every generation


def full_res_layer_kernel(x_ref, w1_ref, b1_ref, w2_ref, b2_ref, o_ref):
    # TODO(synk): nn.Dropout is identity here (eval mode); training-mode
    # dropout would use pltpu.prng_seed + pltpu.stateful_bernoulli.
    x = x_ref[...]                       # [TB, Dp], f32 or bf16 (activation I/O)
    x_mxu = x.astype(jnp.bfloat16)       # MXU operand
    x_res = x.astype(jnp.float32)        # residual carried in f32

    # Linear1 + LeakyReLU (bf16 operands, f32 accumulate, f32 elementwise)
    h = jnp.dot(x_mxu, w1_ref[...], preferred_element_type=jnp.float32) + b1_ref[...]
    h = _leaky_relu(h)

    # Linear2 + residual + LeakyReLU
    r = jnp.dot(h.astype(jnp.bfloat16), w2_ref[...],
                preferred_element_type=jnp.float32) + b2_ref[...]
    o_ref[...] = _leaky_relu(r + x_res).astype(o_ref.dtype)


@functools.partial(jax.jit,
                   static_argnames=("block_batch", "single_buffer_weights", "donate_x"))
def _forward_impl(x, w1, b1, w2, b2, *, block_batch, single_buffer_weights, donate_x):
    B, D = x.shape
    act_dtype = x.dtype
    act_bytes = jnp.dtype(act_dtype).itemsize

    # ---- feature dim: pad to 128 lanes ONLY when needed; aligned D skips the
    # extra activation copy entirely.
    # TODO(synk): for large compute-bound D on 256-wide MXU parts (v6e/v7x),
    # rounding Dp to a multiple of 256 fills both MXU faces; kept at 128 here.
    Dp = _round_up(max(D, 128), 128)
    pad_d = Dp - D

    w1p = jnp.asarray(w1, jnp.bfloat16)
    w2p = jnp.asarray(w2, jnp.bfloat16)
    b1p = jnp.asarray(b1, jnp.float32).reshape(1, D)
    b2p = jnp.asarray(b2, jnp.float32).reshape(1, D)
    xp = x
    if pad_d:
        # Zero padding is exact for this module (leaky_relu(0) == 0).
        xp = jnp.pad(x, ((0, 0), (0, pad_d)))
        w1p = jnp.pad(w1p, ((0, pad_d), (0, pad_d)))
        w2p = jnp.pad(w2p, ((0, pad_d), (0, pad_d)))
        b1p = jnp.pad(b1p, ((0, 0), (0, pad_d)))
        b2p = jnp.pad(b2p, ((0, 0), (0, pad_d)))

    # ---- VMEM budget (generation-aware, includes in-kernel intermediates) ----
    buf_mult = 1 if single_buffer_weights else 2
    wgt_bytes = buf_mult * (2 * Dp * Dp * 2 + 2 * Dp * 4)    # bf16 w1,w2 + f32 b1,b2
    # per-row VMEM: double-buffered x & out tiles + intermediates
    # (h f32, r f32, bf16 copies of x and h)
    per_row = Dp * (2 * act_bytes + 2 * act_bytes + 4 + 4 + 2 + 2)
    headroom = 2 * 2**20
    budget_cap = int(_vmem_cap_bytes() * 0.75)               # Mosaic scratch headroom

    # ---- batch tiling: no batch padding; ragged last block via cdiv grid ----
    g = 8 if act_bytes >= 4 else 16                          # sublane granularity
    if B <= g:
        TB = B                                               # block == full dim is legal
    else:
        tb_cap = max(g, ((budget_cap - wgt_bytes - headroom) // max(per_row, 1)) // g * g)
        tb_mega = _round_up(_cdiv(B, 2), g)                  # >=2 tiles -> both v7x TCs busy
        TB = max(g, min(_round_up(block_batch, g), tb_cap, tb_mega))
    grid = (_cdiv(B, TB),)

    vmem_limit = int(min(budget_cap,
                         max(wgt_bytes + TB * per_row + headroom, 16 * 2**20)))
    # TODO(synk): when the resident bf16 weights alone no longer fit the budget
    # (large Dp, especially on v7x's 64 MiB VMEM), switch to a K/N-tiled grid
    # with a VMEM f32 accumulator instead of this fully-resident-weights scheme.

    def _resident(shape):
        if single_buffer_weights:
            # constant index_map -> fetched once; one buffer is enough
            return pl.BlockSpec(shape, lambda i: (0, 0), pipeline_mode=pl.Buffered(1))
        return pl.BlockSpec(shape, lambda i: (0, 0))

    cost = pl.CostEstimate(
        flops=4 * B * Dp * Dp,                               # two [TB,Dp]x[Dp,Dp] matmuls
        transcendentals=0,
        bytes_accessed=(B * Dp * act_bytes * 2               # x in + out
                        + 2 * Dp * Dp * 2 + 2 * Dp * 4),     # weights + biases
    )

    out = pl.pallas_call(
        full_res_layer_kernel,
        out_shape=jax.ShapeDtypeStruct((B, Dp), act_dtype),
        grid_spec=pltpu.PrefetchScalarGridSpec(
            num_scalar_prefetch=0,
            grid=grid,
            in_specs=[
                pl.BlockSpec((TB, Dp), lambda i: (i, 0)),    # x tile (pipelined)
                _resident((Dp, Dp)),                         # w1 (VMEM-resident)
                _resident((1, Dp)),                          # b1
                _resident((Dp, Dp)),                         # w2
                _resident((1, Dp)),                          # b2
            ],
            out_specs=pl.BlockSpec((TB, Dp), lambda i: (i, 0)),
        ),
        compiler_params=pltpu.CompilerParams(
            dimension_semantics=("parallel",),               # v7x: 2 TCs split batch tiles
            vmem_limit_bytes=vmem_limit,
        ),
        cost_estimate=cost,
        input_output_aliases=({0: 0} if donate_x else {}),
    )(xp, w1p, b1p, w2p, b2p)

    return out[:, :D] if pad_d else out


def full_res_layer_forward(x, w1, b1, w2, b2, *, block_batch=1024, donate_x=False):
    """FullResLayer forward. x: [B, D] (f32 or bf16); w*: [D, D]; b*: [D] or [1, D]."""
    try:
        return _forward_impl(x, w1, b1, w2, b2, block_batch=block_batch,
                             single_buffer_weights=True, donate_x=donate_x)
    except Exception:
        # pipeline_mode=pl.Buffered(1) unsupported on this jax version/backend:
        # fall back to default double-buffered resident weights.
        return _forward_impl(x, w1, b1, w2, b2, block_batch=block_batch,
                             single_buffer_weights=False, donate_x=donate_x)


def init_params(key, in_dim):
    """PyTorch-Linear-like uniform init; weights bf16, biases f32 [1, in_dim]."""
    def linear(k):
        kw, kb = jax.random.split(k)
        bound = float(in_dim) ** -0.5
        w = jax.random.uniform(kw, (in_dim, in_dim), jnp.float32, -bound, bound)
        b = jax.random.uniform(kb, (1, in_dim), jnp.float32, -bound, bound)
        return w.astype(jnp.bfloat16), b

    k1, k2 = jax.random.split(key)
    w1, b1 = linear(k1)
    w2, b2 = linear(k2)
    return w1, b1, w2, b2


def reference_forward(x, w1, b1, w2, b2):
    """Pure-JAX reference with the same bf16-operand / f32-accumulate contract."""
    b1 = jnp.asarray(b1, jnp.float32).reshape(1, -1)
    b2 = jnp.asarray(b2, jnp.float32).reshape(1, -1)
    xf = x.astype(jnp.float32)
    h = _leaky_relu(jnp.dot(x.astype(jnp.bfloat16), jnp.asarray(w1, jnp.bfloat16),
                            preferred_element_type=jnp.float32) + b1)
    r = jnp.dot(h.astype(jnp.bfloat16), jnp.asarray(w2, jnp.bfloat16),
                preferred_element_type=jnp.float32) + b2
    return _leaky_relu(r + xf).astype(x.dtype)


if __name__ == "__main__":
    key = jax.random.PRNGKey(0)
    kx, kp = jax.random.split(key)

    # Main case: lane-aligned D (no wrapper pad), batch split into 2 tiles.
    batch, in_dim = 16, 128
    x = jax.random.normal(kx, (batch, in_dim), jnp.float32)
    w1, b1, w2, b2 = init_params(kp, in_dim)

    out = jax.block_until_ready(full_res_layer_forward(x, w1, b1, w2, b2))
    ref = reference_forward(x, w1, b1, w2, b2)
    assert out.shape == x.shape and out.dtype == x.dtype
    assert jnp.allclose(out, ref, atol=2e-4, rtol=2e-4), "f32 aligned path mismatch"

    # Ragged batch + non-aligned feature dim (padded path, partial last block).
    x2 = jax.random.normal(jax.random.PRNGKey(1), (10, 64), jnp.float32)
    w1b, b1b, w2b, b2b = init_params(jax.random.PRNGKey(2), 64)
    out2 = jax.block_until_ready(full_res_layer_forward(x2, w1b, b1b, w2b, b2b))
    ref2 = reference_forward(x2, w1b, b1b, w2b, b2b)
    assert out2.shape == x2.shape
    assert jnp.allclose(out2, ref2, atol=2e-4, rtol=2e-4), "padded/ragged path mismatch"

    # bf16 activation-I/O path (halves activation HBM traffic).
    xb = x.astype(jnp.bfloat16)
    out3 = jax.block_until_ready(full_res_layer_forward(xb, w1, b1, w2, b2))
    ref3 = reference_forward(xb, w1, b1, w2, b2)
    assert out3.dtype == jnp.bfloat16
    assert jnp.allclose(out3.astype(jnp.float32), ref3.astype(jnp.float32),
                        atol=3e-2, rtol=3e-2), "bf16 I/O path mismatch"

    print("KERNEL_OK")
</pallas_src>

<mosaic_0001>
module attributes {stable_mosaic.version = 11 : i64} {
  func.func @full_res_layer_kernel(%arg0: i32, %arg1: memref<8x128xf32, #tpu.memory_space<vmem>>, %arg2: memref<128x128xbf16, #tpu.memory_space<vmem>>, %arg3: memref<1x128xf32, #tpu.memory_space<vmem>>, %arg4: memref<128x128xbf16, #tpu.memory_space<vmem>>, %arg5: memref<1x128xf32, #tpu.memory_space<vmem>>, %arg6: memref<8x128xf32, #tpu.memory_space<vmem>>) attributes {dimension_semantics = [#tpu.dimension_semantics<parallel>], iteration_bounds = array<i64: 2>, scalar_prefetch = 0 : i64, scratch_operands = 0 : i64, tpu.core_type = #tpu.core_type<tc>, window_params = [{transform_indices = @transform_0, window_bounds = array<i64: 8, 128>}, {pipeline_mode = #tpu.pipeline_mode<synchronous>, transform_indices = @transform_1, window_bounds = array<i64: 128, 128>}, {pipeline_mode = #tpu.pipeline_mode<synchronous>, transform_indices = @transform_2, window_bounds = array<i64: 1, 128>}, {pipeline_mode = #tpu.pipeline_mode<synchronous>, transform_indices = @transform_3, window_bounds = array<i64: 128, 128>}, {pipeline_mode = #tpu.pipeline_mode<synchronous>, transform_indices = @transform_4, window_bounds = array<i64: 1, 128>}, {transform_indices = @transform_5, window_bounds = array<i64: 8, 128>}]} {
    %c0 = arith.constant 0 : index
    %c0_0 = arith.constant 0 : index
    %0 = vector.load %arg1[%c0, %c0_0] : memref<8x128xf32, #tpu.memory_space<vmem>>, vector<8x128xf32>
    %1 = arith.truncf %0 : vector<8x128xf32> to vector<8x128xbf16>
    %c0_1 = arith.constant 0 : index
    %c0_2 = arith.constant 0 : index
    %2 = vector.load %arg2[%c0_1, %c0_2] : memref<128x128xbf16, #tpu.memory_space<vmem>>, vector<128x128xbf16>
    %cst = arith.constant dense<0.000000e+00> : vector<8x128xf32>
    %3 = tpu.matmul %1, %2, %cst {dimension_numbers = #tpu.dot_dimension_numbers<[1], [0], [0], [1], [0, 0, 1, 1], [], []>} : vector<8x128xbf16>, vector<128x128xbf16>, vector<8x128xf32> -> vector<8x128xf32>
    %c0_3 = arith.constant 0 : index
    %c0_4 = arith.constant 0 : index
    %4 = vector.load %arg3[%c0_3, %c0_4] : memref<1x128xf32, #tpu.memory_space<vmem>>, vector<1x128xf32>
    %5 = vector.broadcast %4 : vector<1x128xf32> to vector<8x128xf32>
    %6 = arith.addf %3, %5 : vector<8x128xf32>
    %cst_5 = arith.constant 0.000000e+00 : f32
    %7 = vector.broadcast %cst_5 : f32 to vector<8x128xf32>
    %8 = arith.cmpf ogt, %6, %7 : vector<8x128xf32>
    %cst_6 = arith.constant 0.00999999977 : f32
    %9 = vector.broadcast %cst_6 : f32 to vector<8x128xf32>
    %10 = arith.mulf %9, %6 : vector<8x128xf32>
    %11 = arith.select %8, %6, %10 : vector<8x128xi1>, vector<8x128xf32>
    %12 = arith.truncf %11 : vector<8x128xf32> to vector<8x128xbf16>
    %c0_7 = arith.constant 0 : index
    %c0_8 = arith.constant 0 : index
    %13 = vector.load %arg4[%c0_7, %c0_8] : memref<128x128xbf16, #tpu.memory_space<vmem>>, vector<128x128xbf16>
    %cst_9 = arith.constant dense<0.000000e+00> : vector<8x128xf32>
    %14 = tpu.matmul %12, %13, %cst_9 {dimension_numbers = #tpu.dot_dimension_numbers<[1], [0], [0], [1], [0, 0, 1, 1], [], []>} : vector<8x128xbf16>, vector<128x128xbf16>, vector<8x128xf32> -> vector<8x128xf32>
    %c0_10 = arith.constant 0 : index
    %c0_11 = arith.constant 0 : index
    %15 = vector.load %arg5[%c0_10, %c0_11] : memref<1x128xf32, #tpu.memory_space<vmem>>, vector<1x128xf32>
    %16 = vector.broadcast %15 : vector<1x128xf32> to vector<8x128xf32>
    %17 = arith.addf %14, %16 : vector<8x128xf32>
    %18 = arith.addf %17, %0 : vector<8x128xf32>
    %cst_12 = arith.constant 0.000000e+00 : f32
    %19 = vector.broadcast %cst_12 : f32 to vector<8x128xf32>
    %20 = arith.cmpf ogt, %18, %19 : vector<8x128xf32>
    %cst_13 = arith.constant 0.00999999977 : f32
    %21 = vector.broadcast %cst_13 : f32 to vector<8x128xf32>
    %22 = arith.mulf %21, %18 : vector<8x128xf32>
    %23 = arith.select %20, %18, %22 : vector<8x128xi1>, vector<8x128xf32>
    %c0_14 = arith.constant 0 : index
    %c0_15 = arith.constant 0 : index
    %24 = vector.load %arg6[%c0_14, %c0_15] : memref<8x128xf32, #tpu.memory_space<vmem>>, vector<8x128xf32>
    tpu.vector_store %arg6[%c0_14, %c0_15], %23 {strides = array<i32>} : memref<8x128xf32, #tpu.memory_space<vmem>>, vector<8x128xf32>,
    return
  }
  func.func @transform_0(%arg0: i32) -> (i32, i32) {
    %c0_i32 = arith.constant 0 : i32
    %c0_i32_0 = arith.constant 0 : i32
    return %arg0, %c0_i32 : i32, i32
  }
  func.func @transform_1(%arg0: i32) -> (i32, i32) {
    %c0_i32 = arith.constant 0 : i32
    %c0_i32_0 = arith.constant 0 : i32
    %c0_i32_1 = arith.constant 0 : i32
    return %c0_i32, %c0_i32_0 : i32, i32
  }
  func.func @transform_2(%arg0: i32) -> (i32, i32) {
    %c0_i32 = arith.constant 0 : i32
    %c0_i32_0 = arith.constant 0 : i32
    %c0_i32_1 = arith.constant 0 : i32
    return %c0_i32, %c0_i32_0 : i32, i32
  }
  func.func @transform_3(%arg0: i32) -> (i32, i32) {
    %c0_i32 = arith.constant 0 : i32
    %c0_i32_0 = arith.constant 0 : i32
    %c0_i32_1 = arith.constant 0 : i32
    return %c0_i32, %c0_i32_0 : i32, i32
  }
  func.func @transform_4(%arg0: i32) -> (i32, i32) {
    %c0_i32 = arith.constant 0 : i32
    %c0_i32_0 = arith.constant 0 : i32
    %c0_i32_1 = arith.constant 0 : i32
    return %c0_i32, %c0_i32_0 : i32, i32
  }
  func.func @transform_5(%arg0: i32) -> (i32, i32) {
    %c0_i32 = arith.constant 0 : i32
    %c0_i32_0 = arith.constant 0 : i32
    return %arg0, %c0_i32 : i32, i32
  }
}

module attributes {stable_mosaic.version = 11 : i64} {
  func.func @full_res_layer_kernel(%arg0: i32, %arg1: memref<8x128xf32, #tpu.memory_space<vmem>>, %arg2: memref<128x128xbf16, #tpu.memory_space<vmem>>, %arg3: memref<1x128xf32, #tpu.memory_space<vmem>>, %arg4: memref<128x128xbf16, #tpu.memory_space<vmem>>, %arg5: memref<1x128xf32, #tpu.memory_space<vmem>>, %arg6: memref<8x128xf32, #tpu.memory_space<vmem>>) attributes {dimension_semantics = [#tpu.dimension_semantics<parallel>], iteration_bounds = array<i64: 2>, scalar_prefetch = 0 : i64, scratch_operands = 0 : i64, tpu.core_type = #tpu.core_type<tc>, window_params = [{transform_indices = @transform_0, window_bounds = array<i64: 8, 128>}, {pipeline_mode = #tpu.pipeline_mode<synchronous>, transform_indices = @transform_1, window_bounds = array<i64: 128, 128>}, {pipeline_mode = #tpu.pipeline_mode<synchronous>, transform_indices = @transform_2, window_bounds = array<i64: 1, 128>}, {pipeline_mode = #tpu.pipeline_mode<synchronous>, transform_indices = @transform_3, window_bounds = array<i64: 128, 128>}, {pipeline_mode = #tpu.pipeline_mode<synchronous>, transform_indices = @transform_4, window_bounds = array<i64: 1, 128>}, {transform_indices = @transform_5, window_bounds = array<i64: 8, 128>}]} {
    %c0 = arith.constant 0 : index
    %c0_0 = arith.constant 0 : index
    %0 = vector.load %arg1[%c0, %c0_0] : memref<8x128xf32, #tpu.memory_space<vmem>>, vector<8x128xf32>
    %1 = arith.truncf %0 : vector<8x128xf32> to vector<8x128xbf16>
    %c0_1 = arith.constant 0 : index
    %c0_2 = arith.constant 0 : index
    %2 = vector.load %arg2[%c0_1, %c0_2] : memref<128x128xbf16, #tpu.memory_space<vmem>>, vector<128x128xbf16>
    %cst = arith.constant dense<0.000000e+00> : vector<8x128xf32>
    %3 = tpu.matmul %1, %2, %cst {dimension_numbers = #tpu.dot_dimension_numbers<[1], [0], [0], [1], [0, 0, 1, 1], [], []>} : vector<8x128xbf16>, vector<128x128xbf16>, vector<8x128xf32> -> vector<8x128xf32>
    %c0_3 = arith.constant 0 : index
    %c0_4 = arith.constant 0 : index
    %4 = vector.load %arg3[%c0_3, %c0_4] : memref<1x128xf32, #tpu.memory_space<vmem>>, vector<1x128xf32>
    %5 = vector.broadcast %4 : vector<1x128xf32> to vector<8x128xf32>
    %6 = arith.addf %3, %5 : vector<8x128xf32>
    %cst_5 = arith.constant 0.000000e+00 : f32
    %7 = vector.broadcast %cst_5 : f32 to vector<8x128xf32>
    %8 = arith.cmpf ogt, %6, %7 : vector<8x128xf32>
    %cst_6 = arith.constant 0.00999999977 : f32
    %9 = vector.broadcast %cst_6 : f32 to vector<8x128xf32>
    %10 = arith.mulf %9, %6 : vector<8x128xf32>
    %11 = arith.select %8, %6, %10 : vector<8x128xi1>, vector<8x128xf32>
    %12 = arith.truncf %11 : vector<8x128xf32> to vector<8x128xbf16>
    %c0_7 = arith.constant 0 : index
    %c0_8 = arith.constant 0 : index
    %13 = vector.load %arg4[%c0_7, %c0_8] : memref<128x128xbf16, #tpu.memory_space<vmem>>, vector<128x128xbf16>
    %cst_9 = arith.constant dense<0.000000e+00> : vector<8x128xf32>
    %14 = tpu.matmul %12, %13, %cst_9 {dimension_numbers = #tpu.dot_dimension_numbers<[1], [0], [0], [1], [0, 0, 1, 1], [], []>} : vector<8x128xbf16>, vector<128x128xbf16>, vector<8x128xf32> -> vector<8x128xf32>
    %c0_10 = arith.constant 0 : index
    %c0_11 = arith.constant 0 : index
    %15 = vector.load %arg5[%c0_10, %c0_11] : memref<1x128xf32, #tpu.memory_space<vmem>>, vector<1x128xf32>
    %16 = vector.broadcast %15 : vector<1x128xf32> to vector<8x128xf32>
    %17 = arith.addf %14, %16 : vector<8x128xf32>
    %18 = arith.addf %17, %0 : vector<8x128xf32>
    %cst_12 = arith.constant 0.000000e+00 : f32
    %19 = vector.broadcast %cst_12 : f32 to vector<8x128xf32>
    %20 = arith.cmpf ogt, %18, %19 : vector<8x128xf32>
    %cst_13 = arith.constant 0.00999999977 : f32
    %21 = vector.broadcast %cst_13 : f32 to vector<8x128xf32>
    %22 = arith.mulf %21, %18 : vector<8x128xf32>
    %23 = arith.select %20, %18, %22 : vector<8x128xi1>, vector<8x128xf32>
    %c0_14 = arith.constant 0 : index
    %c0_15 = arith.constant 0 : index
    %24 = vector.load %arg6[%c0_14, %c0_15] : memref<8x128xf32, #tpu.memory_space<vmem>>, vector<8x128xf32>
    tpu.vector_store %arg6[%c0_14, %c0_15], %23 {strides = array<i32>} : memref<8x128xf32, #tpu.memory_space<vmem>>, vector<8x128xf32>,
    return
  }
  func.func @transform_0(%arg0: i32) -> (i32, i32) {
    %c0_i32 = arith.constant 0 : i32
    %c0_i32_0 = arith.constant 0 : i32
    return %arg0, %c0_i32 : i32, i32
  }
  func.func @transform_1(%arg0: i32) -> (i32, i32) {
    %c0_i32 = arith.constant 0 : i32
    %c0_i32_0 = arith.constant 0 : i32
    %c0_i32_1 = arith.constant 0 : i32
    return %c0_i32, %c0_i32_0 : i32, i32
  }
  func.func @transform_2(%arg0: i32) -> (i32, i32) {
    %c0_i32 = arith.constant 0 : i32
    %c0_i32_0 = arith.constant 0 : i32
    %c0_i32_1 = arith.constant 0 : i32
    return %c0_i32, %c0_i32_0 : i32, i32
  }
  func.func @transform_3(%arg0: i32) -> (i32, i32) {
    %c0_i32 = arith.constant 0 : i32
    %c0_i32_0 = arith.constant 0 : i32
    %c0_i32_1 = arith.constant 0 : i32
    return %c0_i32, %c0_i32_0 : i32, i32
  }
  func.func @transform_4(%arg0: i32) -> (i32, i32) {
    %c0_i32 = arith.constant 0 : i32
    %c0_i32_0 = arith.constant 0 : i32
    %c0_i32_1 = arith.constant 0 : i32
    return %c0_i32, %c0_i32_0 : i32, i32
  }
  func.func @transform_5(%arg0: i32) -> (i32, i32) {
    %c0_i32 = arith.constant 0 : i32
    %c0_i32_0 = arith.constant 0 : i32
    return %arg0, %c0_i32 : i32, i32
  }
}

</mosaic_0001>

<bundles_post_ra>
// kernel: _forward_impl.1
= control target key start
LH: loop header
LB: loop body
LE: loop exit
PB: predicated region body
PF: predicated region fallthrough
CT: control target
= control target key end

     0   :  { %10 = vsyncpa [#allocation3], 0  ;;  %s1223_s0 = inlined_call_operand.hbm [shape: f32[16,128], index: 0, kind: input, shape index: {}]   ;;  %s1224_s1 = inlined_call_operand.hbm [shape: bf16[128,128], index: 1, kind: input, shape index: {}]   ;;  %s1225_s2 = inlined_call_operand.vmem [shape: f32[1,128], index: 2, kind: input, shape index: {}]   ;;  %s1226_s3 = inlined_call_operand.hbm [shape: bf16[128,128], index: 3, kind: input, shape index: {}]   ;;  %s1227_s4 = inlined_call_operand.vmem [shape: f32[1,128], index: 4, kind: input, shape index: {}]   ;;  %s1228_s5 = inlined_call_operand.hbm [shape: f32[16,128], index: 5, kind: output, shape index: {}]  }
   0x1   :  { %12 = vsyncpa [#allocation3 + $0x1], 0 }
   0x2   :  { %13 = vsyncpa [#allocation6], 0 }
   0x3   :  { %14 = vsyncpa [#allocation4], 0 }
   0x4   :  { %16 = vsyncpa [#allocation4 + $0x1], 0  ;;  %s981_s18 = smov 0   ;;  %s983_s19 = smov 0  }
   0x5   :  { %s985_s20 = smov 0   ;;  %s987_s21 = smov 0  }
   0x6 LB: > { %s1002_s22 = sadd.s32 4294967295, %s941_s21   ;;  %s606_s23 = sadd.s32 4294967294, %s941_s21   ;;  %s941_s21 = sphi %s987_s21, %s1248_s21   ;;  %s937_s20 = sphi %s985_s20, %s1247_s20   ;;  %s933_s19 = sphi %s983_s19, %s1246_s19   ;;  %s929_s18 = sphi %s981_s18, %s1245_s18  }
   0x7   : > { %p42_p0 = scmp.ne.s32.totalorder %s933_s19, %s929_s18  ;;  %p1229_p1 = scmp.eq.s32.totalorder %s1002_s22, 0 }
   0x8   : > { %p156_p3 = scmp.eq.s32.totalorder %s606_s23, 1  ;;  %p607_p5 = scmp.ge.s32.totalorder %s941_s21, 1 }
   0x9   : > { %p1011_p4 = por %p1229_p1, %p42_p0  ;;  %p163_p7 = scmp.lt.s32.totalorder %s941_s21, 3 }
   0xa   : > { %p1016_p6 = por %p156_p3, %p42_p0  ;;  %s943_s27 = smov [#allocation5]  }
   0xb   : > { %s1232_s24 = scalar_select %p1011_p4, 1, 0 }
   0xc   : > { %s1233_s25 = scalar_select %p1016_p6, 1, 0 }
   0xd   : > { %p1021_p8 = pnand %p607_p5, %p163_p7  ;;  %s175_s28 = sshll.u32 %s943_s27, 4  ;;  %s1025_s28 = int_to_ptr.vmem [resolvable:$true] %s175_s28 }
   0xe   : > { %s944_s30 = smov [#allocation7]   ;;  %s785_s9 = scalar_lea.hbm %s1224_s1, 1024 }
   0xf   : > { %p710_p9 = pneg %p1021_p8  ;;  %s191_s6 = sshll.u32 %s944_s30, 4  ;;  %s1036_s6 = int_to_ptr.vmem [resolvable:$true] %s191_s6 }
  0x10   : > { %p786_p12 = scmp.ne.s32.totalorder %s1224_s1, %s785_s9  ;;  %p792_p5 = scmp.lt.u32.totalorder %s785_s9, %s1224_s1 }
  0x11   : > { %p1032_p11 = pnand %p710_p9, %p1229_p1 }
  0x13   : > { %p787_p13 = pneg %p1032_p11 }
  0x15   : > { %p788_p0 = pnand %p787_p13, %p786_p12 }
  0x17   : > { %p789_p3 = pneg %p788_p0 }
  0x19   : > { %p794_p7 = pnand %p792_p5, %p789_p3 }
  0x1b   : > { %797 = shalt.err (!%p794_p7)
}
  0x1c   : > { %s798_s14 = scalar_lea.vmem %s1025_s28, 1024  ;;  %p806_p2 = scmp.lt.s32.totalorder %s1025_s28, %s1025_s28 }
  0x1d   : > { %p799_p9 = scmp.ne.s32.totalorder %s1025_s28, %s798_s14  ;;  %p807_p12 = scmp.lt.s32.totalorder %s798_s14, %s798_s14 }
  0x1f   : > { %p801_p10 = pnand %p799_p9, %p787_p13  ;;  %p808_p0 = por %p807_p12, %p806_p2 }
  0x21   : > { %p802_p1 = pneg %p801_p10 }
  0x23   : > { %p809_p6 = pnand %p808_p0, %p802_p1 }
  0x25   : > { %812 = shalt.err (!%p809_p6)
}
  0x26   : > { %s945_s15 = smov 64   ;;  %s946_s16 = smov 4  }
  0x27   : > { %713 = dma.hbm_to_vmem [thread:$0]  (!%p1032_p11), %s1224_s1, 1024, %s1025_s28, [#allocation6], %s945_s15, %s945_s15, %s946_s16  }
  0x28   : > { %s813_s7 = scalar_lea.hbm %s1226_s3, 1024 }
  0x29   : > { %p814_p2 = scmp.ne.s32.totalorder %s1226_s3, %s813_s7  ;;  %p820_p10 = scmp.lt.u32.totalorder %s813_s7, %s1226_s3 }
  0x2b   : > { %p816_p1 = pnand %p814_p2, %p787_p13 }
  0x2d   : > { %p817_p6 = pneg %p816_p1 }
  0x2f   : > { %p822_p3 = pnand %p820_p10, %p817_p6 }
  0x31   : > { %825 = shalt.err (!%p822_p3)
}
  0x32   : > { %s826_s28 = scalar_lea.vmem %s1036_s6, 1024  ;;  %p834_p12 = scmp.lt.s32.totalorder %s1036_s6, %s1036_s6 }
  0x33   : > { %p827_p5 = scmp.ne.s32.totalorder %s1036_s6, %s826_s28  ;;  %p835_p0 = scmp.lt.s32.totalorder %s826_s28, %s826_s28 }
  0x35   : > { %p829_p7 = pnand %p827_p5, %p787_p13  ;;  %p836_p2 = por %p835_p0, %p834_p12 }
  0x37   : > { %p830_p9 = pneg %p829_p7 }
  0x39   : > { %p837_p1 = pnand %p836_p2, %p830_p9 }
  0x3b   : > { %840 = shalt.err (!%p837_p1)
}
  0x3c   : > { %716 = dma.hbm_to_vmem [thread:$0]  (!%p1032_p11), %s1226_s3, 1024, %s1036_s6, [#allocation6], %s945_s15, %s945_s15, %s946_s16  }
  0x3d   : > { %s1091_s14 = sadd.s32 1, %s941_s21   ;;  %s29_s29 = sadd.s32 1, %s937_s20 }
  0x3e   : > { %s26_s17 = ssub.s32 %s941_s21, %s1091_s14  ;;  %p36_p13 = scmp.ne.s32.totalorder %s937_s20, %s933_s19 }
  0x3f   : > { %p27_p6 = scmp.eq.s32.totalorder %s26_s17, 0  ;;  %p37_p10 = scmp.eq.s32.totalorder %s941_s21, 0 }
  0x40   : > { %p1236_p3 = scmp.eq.s32.totalorder %s1002_s22, 1  ;;  %p727_p7 = scmp.lt.s32.totalorder %s941_s21, 2 }
  0x41   : > { %s1107_s27 = scalar_select %p27_p6, %s937_s20, %s29_s29  }
  0x42   : > { %p1101_p5 = por %p1236_p3, %p36_p13  ;;  %p38_p9 = por %p37_p10, %p36_p13 }
  0x43   : > { %s208_s30 = sand.u32 1, %s937_s20   ;;  %s612_s6 = sshll.u32 %s941_s21, 7 }
  0x44   : > { %s1237_s23 = scalar_select %p1101_p5, 1, 0 }
  0x45   : > { %s611_s7 = sshll.u32 %s208_s30, 3  ;;  %s1114_s8 = scalar_lea.hbm %s1223_s0, %s612_s6 }
  0x46   : > { %s212_s9 = scalar_lea.vmem [#allocation2], %s611_s7  ;;  %p1118_p11 = pnand %p727_p7, %p38_p9 }
  0x47   : > { %s219_s10 = sshll.u32 %s212_s9, 4  ;;  %s209_s28 = scalar_lea.sflag [#allocation3], %s208_s30  ;;  %s1116_s10 = int_to_ptr.vmem [resolvable:$true] %s219_s10 }
  0x48   : > { %s841_s12 = scalar_lea.hbm %s1114_s8, 128  ;;  %p843_p0 = pneg %p1118_p11 }
  0x49   : > { %p842_p12 = scmp.ne.s32.totalorder %s1114_s8, %s841_s12  ;;  %s846_s17 = scalar_lea.hbm %s1223_s0, 256 }
  0x4a   : > { %p847_p13 = scmp.lt.u32.totalorder %s1114_s8, %s1223_s0  ;;  %p848_p6 = scmp.lt.u32.totalorder %s846_s17, %s841_s12 }
  0x4b   : > { %p844_p2 = pnand %p843_p0, %p842_p12  ;;  %p850_p3 = scmp.lt.u32.totalorder %s841_s12, %s1114_s8 }
  0x4c   : > { %p849_p10 = por %p848_p6, %p847_p13 }
  0x4d   : > { %p845_p1 = pneg %p844_p2 }
  0x4e   : > { %p851_p7 = por %p850_p3, %p849_p10 }
  0x50   : > { %p852_p9 = pnand %p851_p7, %p845_p1 }
  0x52   : > { %855 = shalt.err (!%p852_p9)
}
  0x53   : > { %s856_s30 = scalar_lea.vmem %s1116_s10, 128  ;;  %s947_s15 = smov [#allocation2]  }
  0x54   : > { %p857_p12 = scmp.ne.s32.totalorder %s1116_s10, %s856_s30  ;;  %s861_s16 = sshll.u32 %s947_s15, 4  ;;  %s862_s16 = int_to_ptr.vmem [resolvable:$false] %s861_s16 }
  0x55   : > { %s863_s9 = scalar_lea.vmem %s862_s16, 256  ;;  %p864_p4 = scmp.lt.s32.totalorder %s1116_s10, %s862_s16 }
  0x56   : > { %p859_p2 = pnand %p857_p12, %p843_p0  ;;  %p865_p13 = scmp.lt.s32.totalorder %s863_s9, %s856_s30 }
  0x58   : > { %p860_p5 = pneg %p859_p2  ;;  %p866_p6 = por %p865_p13, %p864_p4 }
  0x5a   : > { %p867_p10 = pnand %p866_p6, %p860_p5 }
  0x5c   : > { %870 = shalt.err (!%p867_p10)
}
  0x5d   : > { %720 = dma.hbm_to_vmem [thread:$0]  (!%p1118_p11), %s1114_s8, 128, %s1116_s10, %s209_s28  }
  0x5e   : > { %228 = sbr.rel (%p1021_p8) target bundleno = 591 (0x24f), region = 40  ;;  %s1150_s12 = sand.u32 (!%p1021_p8), 1, %s933_s19  }
  0x5f   : > { %s614_s13 = sshll.u32 (!%p1021_p8), %s1150_s12, 3  ;;  %s231_s29 = scalar_lea.sflag (!%p1021_p8), [#allocation3], %s1150_s12 }
  0x60   : > { %s1156_s17 = scalar_lea.vmem (!%p1021_p8), [#allocation2], %s614_s13  ;;  %p1239_p4 = scmp.ne.s32.totalorder (!%p1021_p8), %s1232_s24, 0 }
  0x65   : > { %916 = dma.done.wait (%p1239_p4), %s231_s29, 128  }
  0x66   : > { %918 = vsyncadd (%p1239_p4), %s231_s29, 4294967168  ;;  %p1240_p5 = scmp.eq.s32.totalorder %s1002_s22, 0 }
  0x68   : > { %920 = dma.done.wait (%p1240_p5), [#allocation6], 2048   ;;  %p1241_p8 = pmov %p1240_p5 }
  0x69   : > { %v948_v0 = vmov 0.0   ;;  %vm949_vm0 = vmmov 0   ;;  %v769_v1 = vld [vmem:[#allocation5] sm:$0xff]   ;;  %v770_v2 = vld [vmem:[#allocation5 + $0x8] sm:$0xff]   ;;  %v771_v3 = vld [vmem:[#allocation5 + $0x10] sm:$0xff]   ;;  %s637_s11 = sshll.u32 %s1002_s22, 7 }
  0x6a   : > { %922 = vsyncadd (%p1241_p8), [#allocation6], 4294965248  ;;  %658 = vmatprep.subr.bf16.mxu0 %v948_v0  ;;  %674 = vmatprep.mubr.msk.bf16.mxu0 %vm949_vm0, %v948_v0  ;;  %v777_v4 = vld [vmem:[#allocation7] sm:$0xff]   ;;  %v772_v5 = vld [vmem:[#allocation5 + $0x18] sm:$0xff]   ;;  %s268_s28 = scalar_lea.vmem [#allocation8], %s614_s13  ;;  %s1179_s15 = scalar_lea.hbm %s1228_s5, %s637_s11 }
  0x6b   : > { %678 = vmatprep.subr.bf16.mxu1 %v948_v0  ;;  %694 = vmatprep.mubr.msk.bf16.mxu1 %vm949_vm0, %v948_v0  ;;  %v778_v6 = vld [vmem:[#allocation7 + $0x8] sm:$0xff]   ;;  %v773_v7 = vld [vmem:[#allocation5 + $0x20] sm:$0xff]   ;;  %v779_v8 = vld [vmem:[#allocation7 + $0x10] sm:$0xff]   ;;  %s517_s7 = sshll.u32 %s268_s28, 4  ;;  %s504_s16 = scalar_lea.sflag [#allocation4], %s1150_s12  ;;  %s1181_s7 = int_to_ptr.vmem [resolvable:$true] %s517_s7 }
  0x6c   : > { %659 = vmatpush3.bf16.msra.mxu0 %v769_v1  ;;  %679 = vmatpush3.bf16.msra.mxu1 %v777_v4  ;;  %v774_v9 = vld [vmem:[#allocation5 + $0x28] sm:$0xff]   ;;  %v780_v10 = vld [vmem:[#allocation7 + $0x18] sm:$0xff]   ;;  %v775_v11 = vld [vmem:[#allocation5 + $0x30] sm:$0xff]   ;;  %s871_s9 = scalar_lea.vmem %s1181_s7, 128  ;;  %p1242_p0 = scmp.ne.s32.totalorder %s1237_s23, 0 }
  0x6d   : > { %660 = vmatprep.subr.bf16.mxu0 %v948_v0  ;;  %680 = vmatprep.subr.bf16.mxu1 %v948_v0  ;;  %v781_v12 = vld [vmem:[#allocation7 + $0x20] sm:$0xff]   ;;  %v776_v13 = vld [vmem:[#allocation5 + $0x38] sm:$0xff]   ;;  %v782_v15 = vld [vmem:[#allocation7 + $0x28] sm:$0xff]   ;;  %p872_p11 = scmp.ne.s32.totalorder %s1181_s7, %s871_s9  ;;  %s950_s22 = smov [#allocation8]  }
  0x6e   : > { %v270_v14 = vld [vmem:[%s1156_s17] sm:$0xff]  ;;  %s875_s13 = sshll.u32 %s950_s22, 4  ;;  %s876_s13 = int_to_ptr.vmem [resolvable:$false] %s875_s13 }
  0x6f   : > { %v271_v16 = vpack.c.bf16 %v270_v14, %v270_v14  ;;  %v783_v17 = vld [vmem:[#allocation7 + $0x30] sm:$0xff]   ;;  %v784_v18 = vld [vmem:[#allocation7 + $0x38] sm:$0xff]   ;;  %p873_p1 = pnand %p872_p11, %p1242_p0  ;;  %s877_s29 = scalar_lea.vmem %s876_s13, 256 }
  0x70   : > { %661 = vmatpush3.bf16.msra.mxu0 %v770_v2  ;;  %681 = vmatpush3.bf16.msra.mxu1 %v778_v6  ;;  %v618_v19 = vld [vmem:[%s1225_s2] ss:$0 sm:$0xff]  ;;  %p878_p7 = scmp.lt.s32.totalorder %s1181_s7, %s876_s13  ;;  %p879_p9 = scmp.lt.s32.totalorder %s877_s29, %s871_s9 }
  0x71   : > { %662 = vmatprep.subr.bf16.mxu0 %v948_v0  ;;  %682 = vmatprep.subr.bf16.mxu1 %v948_v0  ;;  %v627_v28 = vld [vmem:[%s1227_s4] ss:$0 sm:$0xff]  ;;  %p874_p3 = pneg %p873_p1 }
  0x72   : > { %p880_p12 = por %p879_p9, %p878_p7 }
  0x74   : > { %663 = vmatpush3.bf16.msra.mxu0 %v771_v3  ;;  %683 = vmatpush3.bf16.msra.mxu1 %v779_v8  ;;  %p881_p2 = pnand %p880_p12, %p874_p3 }
  0x75   : > { %664 = vmatprep.subr.bf16.mxu0 %v948_v0  ;;  %684 = vmatprep.subr.bf16.mxu1 %v948_v0 }
  0x78   : > { %665 = vmatpush3.bf16.msra.mxu0 %v772_v5  ;;  %685 = vmatpush3.bf16.msra.mxu1 %v780_v10 }
  0x79   : > { %666 = vmatprep.subr.bf16.mxu0 %v948_v0  ;;  %686 = vmatprep.subr.bf16.mxu1 %v948_v0 }
  0x7c   : > { %667 = vmatpush3.bf16.msra.mxu0 %v773_v7  ;;  %687 = vmatpush3.bf16.msra.mxu1 %v781_v12 }
  0x7d   : > { %668 = vmatprep.subr.bf16.mxu0 %v948_v0  ;;  %688 = vmatprep.subr.bf16.mxu1 %v948_v0 }
  0x80   : > { %669 = vmatpush3.bf16.msra.mxu0 %v774_v9  ;;  %689 = vmatpush3.bf16.msra.mxu1 %v782_v15 }
  0x81   : > { %670 = vmatprep.subr.bf16.mxu0 %v948_v0  ;;  %690 = vmatprep.subr.bf16.mxu1 %v948_v0 }
  0x84   : > { %671 = vmatpush3.bf16.msra.mxu0 %v775_v11  ;;  %691 = vmatpush3.bf16.msra.mxu1 %v783_v17 }
  0x85   : > { %672 = vmatprep.subr.bf16.mxu0 %v948_v0  ;;  %692 = vmatprep.subr.bf16.mxu1 %v948_v0 }
  0x88   : > { %673 = vmatpush3.bf16.msra.mxu0 %v776_v13  ;;  %693 = vmatpush3.bf16.msra.mxu1 %v784_v18 }
  0x8b   : > { %675 = vmatmul.mubr.bf16.vlgmr.msra.gmra.mrb[0].mxu0 %v271_v16 }
 0x15e   : > { %v377_v20 = vpop.f32.mrb[0].mxu0 }
 0x15f   : > { %v378_v21 = vadd.f32 %v618_v19, %v377_v20  ;;  %v676_v22 = vpop.f32.mrb[1].mxu0 }
 0x160   : > { %v380_v23 = vpop.f32.mrb[2].mxu0 }
 0x161   : > { %vm383_vm1 = vcmp.gt.f32.partialorder %v378_v21, 0.0  ;;  %v384_v24 = vmul.f32 0.01, %v378_v21  ;;  %v677_v25 = vpop.f32.mrb[3].mxu0 }
 0x163   : > { %v385_v26 = vsel %vm383_vm1, %v378_v21, %v384_v24 }
 0x164   : > { %v386_v27 = vpack.c.bf16 %v385_v26, %v385_v26 }
 0x166   : > { %695 = vmatmul.mubr.bf16.vlgmr.msra.gmra.mrb[0].mxu1 %v386_v27 }
 0x239   : > { %v492_v29 = vpop.f32.mrb[0].mxu1 }
 0x23a   : > { %v493_v30 = vadd.f32 %v627_v28, %v492_v29  ;;  %v696_v31 = vpop.f32.mrb[1].mxu1 }
 0x23b   : > { %v495_v32 = vpop.f32.mrb[2].mxu1 }
 0x23c   : > { %v498_v33 = vadd.f32 %v493_v30, %v270_v14  ;;  %v697_v34 = vpop.f32.mrb[3].mxu1 }
 0x23e   : > { %vm499_vm2 = vcmp.gt.f32.partialorder %v498_v33, 0.0  ;;  %v500_v35 = vmul.f32 0.01, %v498_v33 }
 0x240   : > { %v501_v36 = vsel %vm499_vm2, %v498_v33, %v500_v35 }
 0x241   : > { %502 = vst [vmem:[%s268_s28] sm:$0xff] %v501_v36 }
 0x242   : > { %884 = shalt.err (!%p881_p2)
}
 0x243   : > { %s885_s12 = scalar_lea.hbm %s1179_s15, 128  ;;  %s889_s26 = scalar_lea.hbm %s1228_s5, 256 }
 0x244   : > { %p886_p13 = scmp.ne.s32.totalorder %s1179_s15, %s885_s12  ;;  %p890_p4 = scmp.lt.u32.totalorder %s1179_s15, %s1228_s5 }
 0x245   : > { %p891_p5 = scmp.lt.u32.totalorder %s889_s26, %s885_s12  ;;  %p893_p11 = scmp.lt.u32.totalorder %s885_s12, %s1179_s15 }
 0x246   : > { %p887_p6 = pnand %p886_p13, %p1242_p0 }
 0x247   : > { %p892_p8 = por %p891_p5, %p890_p4 }
 0x248   : > { %p888_p10 = pneg %p887_p6 }
 0x249   : > { %p894_p1 = por %p893_p11, %p892_p8 }
 0x24b   : > { %p895_p3 = pnand %p894_p1, %p888_p10 }
 0x24d   : > { %898 = shalt.err (!%p895_p3)
}
 0x24e   : > { %708 = dma.vmem_to_hbm [thread:$0]  (%p1242_p0), %s1181_s7, 128, %s1179_s15, %s504_s16  }
 0x24f PF: > { %s529_s11 = sand.u32 1, %s929_s18   ;;  %p1243_p7 = scmp.ne.s32.totalorder %s1233_s25, 0 }
 0x250   : > { %p1244_p9 = scmp.ge.s32.totalorder %s941_s21, 2  ;;  %s530_s28 = scalar_lea.sflag [#allocation4], %s529_s11 }
 0x252   : > { %p722_p12 = pnand %p1244_p9, %p1243_p7 }
 0x254   : > { %924 = dma.done.wait (!%p722_p12), %s530_s28, 128  }
 0x255   : > { %926 = vsyncadd (!%p722_p12), %s530_s28, 4294967168  ;;  %p19_p2 = scmp.ge.s32.totalorder %s1091_s14, 4   ;;  %s1245_s18 = smov %s933_s19 }
 0x256   : > { %s1246_s19 = smov %s937_s20  ;;  %s1247_s20 = smov %s1107_s27 }
 0x257   : > { %s1248_s21 = smov %s1091_s14  ;;  %21 = sbr.rel (!%p19_p2) target bundleno = 6 (0x6), region = 93 }
 0x25e   :  { %535 = vsyncpa [#allocation3], 1 }
 0x25f   :  { %537 = vsyncpa [#allocation3 + $0x1], 1 }
 0x260   :  { %538 = vsyncpa [#allocation6], 1 }
 0x261   :  { %539 = vsyncpa [#allocation4], 1 }
 0x262   :  { %541 = vsyncpa [#allocation4 + $0x1], 1 }

// kernel: _forward_impl.1
= control target key start
LH: loop header
LB: loop body
LE: loop exit
PB: predicated region body
PF: predicated region fallthrough
CT: control target
= control target key end

     0   :  { %10 = vsyncpa [#allocation3], 0  ;;  %s1223_s0 = inlined_call_operand.hbm [shape: f32[16,128], index: 0, kind: input, shape index: {}]   ;;  %s1224_s1 = inlined_call_operand.hbm [shape: bf16[128,128], index: 1, kind: input, shape index: {}]   ;;  %s1225_s2 = inlined_call_operand.vmem [shape: f32[1,128], index: 2, kind: input, shape index: {}]   ;;  %s1226_s3 = inlined_call_operand.hbm [shape: bf16[128,128], index: 3, kind: input, shape index: {}]   ;;  %s1227_s4 = inlined_call_operand.vmem [shape: f32[1,128], index: 4, kind: input, shape index: {}]   ;;  %s1228_s5 = inlined_call_operand.hbm [shape: f32[16,128], index: 5, kind: output, shape index: {}]  }
   0x1   :  { %12 = vsyncpa [#allocation3 + $0x1], 0 }
   0x2   :  { %13 = vsyncpa [#allocation6], 0 }
   0x3   :  { %14 = vsyncpa [#allocation4], 0 }
   0x4   :  { %16 = vsyncpa [#allocation4 + $0x1], 0  ;;  %s981_s18 = smov 0   ;;  %s983_s19 = smov 0  }
   0x5   :  { %s985_s20 = smov 0   ;;  %s987_s21 = smov 0  }
   0x6 LB: > { %s1002_s22 = sadd.s32 4294967295, %s941_s21   ;;  %s606_s23 = sadd.s32 4294967294, %s941_s21   ;;  %s941_s21 = sphi %s987_s21, %s1248_s21   ;;  %s937_s20 = sphi %s985_s20, %s1247_s20   ;;  %s933_s19 = sphi %s983_s19, %s1246_s19   ;;  %s929_s18 = sphi %s981_s18, %s1245_s18  }
   0x7   : > { %p42_p0 = scmp.ne.s32.totalorder %s933_s19, %s929_s18  ;;  %p1229_p1 = scmp.eq.s32.totalorder %s1002_s22, 0 }
   0x8   : > { %p156_p3 = scmp.eq.s32.totalorder %s606_s23, 1  ;;  %p607_p5 = scmp.ge.s32.totalorder %s941_s21, 1 }
   0x9   : > { %p1011_p4 = por %p1229_p1, %p42_p0  ;;  %p163_p7 = scmp.lt.s32.totalorder %s941_s21, 3 }
   0xa   : > { %p1016_p6 = por %p156_p3, %p42_p0  ;;  %s943_s27 = smov [#allocation5]  }
   0xb   : > { %s1232_s24 = scalar_select %p1011_p4, 1, 0 }
   0xc   : > { %s1233_s25 = scalar_select %p1016_p6, 1, 0 }
   0xd   : > { %p1021_p8 = pnand %p607_p5, %p163_p7  ;;  %s175_s28 = sshll.u32 %s943_s27, 4  ;;  %s1025_s28 = int_to_ptr.vmem [resolvable:$true] %s175_s28 }
   0xe   : > { %s944_s30 = smov [#allocation7]   ;;  %s785_s9 = scalar_lea.hbm %s1224_s1, 1024 }
   0xf   : > { %p710_p9 = pneg %p1021_p8  ;;  %s191_s6 = sshll.u32 %s944_s30, 4  ;;  %s1036_s6 = int_to_ptr.vmem [resolvable:$true] %s191_s6 }
  0x10   : > { %p786_p12 = scmp.ne.s32.totalorder %s1224_s1, %s785_s9  ;;  %p792_p5 = scmp.lt.u32.totalorder %s785_s9, %s1224_s1 }
  0x11   : > { %p1032_p11 = pnand %p710_p9, %p1229_p1 }
  0x13   : > { %p787_p13 = pneg %p1032_p11 }
  0x15   : > { %p788_p0 = pnand %p787_p13, %p786_p12 }
  0x17   : > { %p789_p3 = pneg %p788_p0 }
  0x19   : > { %p794_p7 = pnand %p792_p5, %p789_p3 }
  0x1b   : > { %797 = shalt.err (!%p794_p7)
}
  0x1c   : > { %s798_s14 = scalar_lea.vmem %s1025_s28, 1024  ;;  %p806_p2 = scmp.lt.s32.totalorder %s1025_s28, %s1025_s28 }
  0x1d   : > { %p799_p9 = scmp.ne.s32.totalorder %s1025_s28, %s798_s14  ;;  %p807_p12 = scmp.lt.s32.totalorder %s798_s14, %s798_s14 }
  0x1f   : > { %p801_p10 = pnand %p799_p9, %p787_p13  ;;  %p808_p0 = por %p807_p12, %p806_p2 }
  0x21   : > { %p802_p1 = pneg %p801_p10 }
  0x23   : > { %p809_p6 = pnand %p808_p0, %p802_p1 }
  0x25   : > { %812 = shalt.err (!%p809_p6)
}
  0x26   : > { %s945_s15 = smov 64   ;;  %s946_s16 = smov 4  }
  0x27   : > { %713 = dma.hbm_to_vmem [thread:$0]  (!%p1032_p11), %s1224_s1, 1024, %s1025_s28, [#allocation6], %s945_s15, %s945_s15, %s946_s16  }
  0x28   : > { %s813_s7 = scalar_lea.hbm %s1226_s3, 1024 }
  0x29   : > { %p814_p2 = scmp.ne.s32.totalorder %s1226_s3, %s813_s7  ;;  %p820_p10 = scmp.lt.u32.totalorder %s813_s7, %s1226_s3 }
  0x2b   : > { %p816_p1 = pnand %p814_p2, %p787_p13 }
  0x2d   : > { %p817_p6 = pneg %p816_p1 }
  0x2f   : > { %p822_p3 = pnand %p820_p10, %p817_p6 }
  0x31   : > { %825 = shalt.err (!%p822_p3)
}
  0x32   : > { %s826_s28 = scalar_lea.vmem %s1036_s6, 1024  ;;  %p834_p12 = scmp.lt.s32.totalorder %s1036_s6, %s1036_s6 }
  0x33   : > { %p827_p5 = scmp.ne.s32.totalorder %s1036_s6, %s826_s28  ;;  %p835_p0 = scmp.lt.s32.totalorder %s826_s28, %s826_s28 }
  0x35   : > { %p829_p7 = pnand %p827_p5, %p787_p13  ;;  %p836_p2 = por %p835_p0, %p834_p12 }
  0x37   : > { %p830_p9 = pneg %p829_p7 }
  0x39   : > { %p837_p1 = pnand %p836_p2, %p830_p9 }
  0x3b   : > { %840 = shalt.err (!%p837_p1)
}
  0x3c   : > { %716 = dma.hbm_to_vmem [thread:$0]  (!%p1032_p11), %s1226_s3, 1024, %s1036_s6, [#allocation6], %s945_s15, %s945_s15, %s946_s16  }
  0x3d   : > { %s1091_s14 = sadd.s32 1, %s941_s21   ;;  %s29_s29 = sadd.s32 1, %s937_s20 }
  0x3e   : > { %s26_s17 = ssub.s32 %s941_s21, %s1091_s14  ;;  %p36_p13 = scmp.ne.s32.totalorder %s937_s20, %s933_s19 }
  0x3f   : > { %p27_p6 = scmp.eq.s32.totalorder %s26_s17, 0  ;;  %p37_p10 = scmp.eq.s32.totalorder %s941_s21, 0 }
  0x40   : > { %p1236_p3 = scmp.eq.s32.totalorder %s1002_s22, 1  ;;  %p727_p7 = scmp.lt.s32.totalorder %s941_s21, 2 }
  0x41   : > { %s1107_s27 = scalar_select %p27_p6, %s937_s20, %s29_s29  }
  0x42   : > { %p1101_p5 = por %p1236_p3, %p36_p13  ;;  %p38_p9 = por %p37_p10, %p36_p13 }
  0x43   : > { %s208_s30 = sand.u32 1, %s937_s20   ;;  %s612_s6 = sshll.u32 %s941_s21, 7 }
  0x44   : > { %s1237_s23 = scalar_select %p1101_p5, 1, 0 }
  0x45   : > { %s611_s7 = sshll.u32 %s208_s30, 3  ;;  %s1114_s8 = scalar_lea.hbm %s1223_s0, %s612_s6 }
  0x46   : > { %s212_s9 = scalar_lea.vmem [#allocation2], %s611_s7  ;;  %p1118_p11 = pnand %p727_p7, %p38_p9 }
  0x47   : > { %s219_s10 = sshll.u32 %s212_s9, 4  ;;  %s209_s28 = scalar_lea.sflag [#allocation3], %s208_s30  ;;  %s1116_s10 = int_to_ptr.vmem [resolvable:$true] %s219_s10 }
  0x48   : > { %s841_s12 = scalar_lea.hbm %s1114_s8, 128  ;;  %p843_p0 = pneg %p1118_p11 }
  0x49   : > { %p842_p12 = scmp.ne.s32.totalorder %s1114_s8, %s841_s12  ;;  %s846_s17 = scalar_lea.hbm %s1223_s0, 256 }
  0x4a   : > { %p847_p13 = scmp.lt.u32.totalorder %s1114_s8, %s1223_s0  ;;  %p848_p6 = scmp.lt.u32.totalorder %s846_s17, %s841_s12 }
  0x4b   : > { %p844_p2 = pnand %p843_p0, %p842_p12  ;;  %p850_p3 = scmp.lt.u32.totalorder %s841_s12, %s1114_s8 }
  0x4c   : > { %p849_p10 = por %p848_p6, %p847_p13 }
  0x4d   : > { %p845_p1 = pneg %p844_p2 }
  0x4e   : > { %p851_p7 = por %p850_p3, %p849_p10 }
  0x50   : > { %p852_p9 = pnand %p851_p7, %p845_p1 }
  0x52   : > { %855 = shalt.err (!%p852_p9)
}
  0x53   : > { %s856_s30 = scalar_lea.vmem %s1116_s10, 128  ;;  %s947_s15 = smov [#allocation2]  }
  0x54   : > { %p857_p12 = scmp.ne.s32.totalorder %s1116_s10, %s856_s30  ;;  %s861_s16 = sshll.u32 %s947_s15, 4  ;;  %s862_s16 = int_to_ptr.vmem [resolvable:$false] %s861_s16 }
  0x55   : > { %s863_s9 = scalar_lea.vmem %s862_s16, 256  ;;  %p864_p4 = scmp.lt.s32.totalorder %s1116_s10, %s862_s16 }
  0x56   : > { %p859_p2 = pnand %p857_p12, %p843_p0  ;;  %p865_p13 = scmp.lt.s32.totalorder %s863_s9, %s856_s30 }
  0x58   : > { %p860_p5 = pneg %p859_p2  ;;  %p866_p6 = por %p865_p13, %p864_p4 }
  0x5a   : > { %p867_p10 = pnand %p866_p6, %p860_p5 }
  0x5c   : > { %870 = shalt.err (!%p867_p10)
}
  0x5d   : > { %720 = dma.hbm_to_vmem [thread:$0]  (!%p1118_p11), %s1114_s8, 128, %s1116_s10, %s209_s28  }
  0x5e   : > { %228 = sbr.rel (%p1021_p8) target bundleno = 591 (0x24f), region = 40  ;;  %s1150_s12 = sand.u32 (!%p1021_p8), 1, %s933_s19  }
  0x5f   : > { %s614_s13 = sshll.u32 (!%p1021_p8), %s1150_s12, 3  ;;  %s231_s29 = scalar_lea.sflag (!%p1021_p8), [#allocation3], %s1150_s12 }
  0x60   : > { %s1156_s17 = scalar_lea.vmem (!%p1021_p8), [#allocation2], %s614_s13  ;;  %p1239_p4 = scmp.ne.s32.totalorder (!%p1021_p8), %s1232_s24, 0 }
  0x65   : > { %916 = dma.done.wait (%p1239_p4), %s231_s29, 128  }
  0x66   : > { %918 = vsyncadd (%p1239_p4), %s231_s29, 4294967168  ;;  %p1240_p5 = scmp.eq.s32.totalorder %s1002_s22, 0 }
  0x68   : > { %920 = dma.done.wait (%p1240_p5), [#allocation6], 2048   ;;  %p1241_p8 = pmov %p1240_p5 }
  0x69   : > { %v948_v0 = vmov 0.0   ;;  %vm949_vm0 = vmmov 0   ;;  %v769_v1 = vld [vmem:[#allocation5] sm:$0xff]   ;;  %v770_v2 = vld [vmem:[#allocation5 + $0x8] sm:$0xff]   ;;  %v771_v3 = vld [vmem:[#allocation5 + $0x10] sm:$0xff]   ;;  %s637_s11 = sshll.u32 %s1002_s22, 7 }
  0x6a   : > { %922 = vsyncadd (%p1241_p8), [#allocation6], 4294965248  ;;  %658 = vmatprep.subr.bf16.mxu0 %v948_v0  ;;  %674 = vmatprep.mubr.msk.bf16.mxu0 %vm949_vm0, %v948_v0  ;;  %v777_v4 = vld [vmem:[#allocation7] sm:$0xff]   ;;  %v772_v5 = vld [vmem:[#allocation5 + $0x18] sm:$0xff]   ;;  %s268_s28 = scalar_lea.vmem [#allocation8], %s614_s13  ;;  %s1179_s15 = scalar_lea.hbm %s1228_s5, %s637_s11 }
  0x6b   : > { %678 = vmatprep.subr.bf16.mxu1 %v948_v0  ;;  %694 = vmatprep.mubr.msk.bf16.mxu1 %vm949_vm0, %v948_v0  ;;  %v778_v6 = vld [vmem:[#allocation7 + $0x8] sm:$0xff]   ;;  %v773_v7 = vld [vmem:[#allocation5 + $0x20] sm:$0xff]   ;;  %v779_v8 = vld [vmem:[#allocation7 + $0x10] sm:$0xff]   ;;  %s517_s7 = sshll.u32 %s268_s28, 4  ;;  %s504_s16 = scalar_lea.sflag [#allocation4], %s1150_s12  ;;  %s1181_s7 = int_to_ptr.vmem [resolvable:$true] %s517_s7 }
  0x6c   : > { %659 = vmatpush3.bf16.msra.mxu0 %v769_v1  ;;  %679 = vmatpush3.bf16.msra.mxu1 %v777_v4  ;;  %v774_v9 = vld [vmem:[#allocation5 + $0x28] sm:$0xff]   ;;  %v780_v10 = vld [vmem:[#allocation7 + $0x18] sm:$0xff]   ;;  %v775_v11 = vld [vmem:[#allocation5 + $0x30] sm:$0xff]   ;;  %s871_s9 = scalar_lea.vmem %s1181_s7, 128  ;;  %p1242_p0 = scmp.ne.s32.totalorder %s1237_s23, 0 }
  0x6d   : > { %660 = vmatprep.subr.bf16.mxu0 %v948_v0  ;;  %680 = vmatprep.subr.bf16.mxu1 %v948_v0  ;;  %v781_v12 = vld [vmem:[#allocation7 + $0x20] sm:$0xff]   ;;  %v776_v13 = vld [vmem:[#allocation5 + $0x38] sm:$0xff]   ;;  %v782_v15 = vld [vmem:[#allocation7 + $0x28] sm:$0xff]   ;;  %p872_p11 = scmp.ne.s32.totalorder %s1181_s7, %s871_s9  ;;  %s950_s22 = smov [#allocation8]  }
  0x6e   : > { %v270_v14 = vld [vmem:[%s1156_s17] sm:$0xff]  ;;  %s875_s13 = sshll.u32 %s950_s22, 4  ;;  %s876_s13 = int_to_ptr.vmem [resolvable:$false] %s875_s13 }
  0x6f   : > { %v271_v16 = vpack.c.bf16 %v270_v14, %v270_v14  ;;  %v783_v17 = vld [vmem:[#allocation7 + $0x30] sm:$0xff]   ;;  %v784_v18 = vld [vmem:[#allocation7 + $0x38] sm:$0xff]   ;;  %p873_p1 = pnand %p872_p11, %p1242_p0  ;;  %s877_s29 = scalar_lea.vmem %s876_s13, 256 }
  0x70   : > { %661 = vmatpush3.bf16.msra.mxu0 %v770_v2  ;;  %681 = vmatpush3.bf16.msra.mxu1 %v778_v6  ;;  %v618_v19 = vld [vmem:[%s1225_s2] ss:$0 sm:$0xff]  ;;  %p878_p7 = scmp.lt.s32.totalorder %s1181_s7, %s876_s13  ;;  %p879_p9 = scmp.lt.s32.totalorder %s877_s29, %s871_s9 }
  0x71   : > { %662 = vmatprep.subr.bf16.mxu0 %v948_v0  ;;  %682 = vmatprep.subr.bf16.mxu1 %v948_v0  ;;  %v627_v28 = vld [vmem:[%s1227_s4] ss:$0 sm:$0xff]  ;;  %p874_p3 = pneg %p873_p1 }
  0x72   : > { %p880_p12 = por %p879_p9, %p878_p7 }
  0x74   : > { %663 = vmatpush3.bf16.msra.mxu0 %v771_v3  ;;  %683 = vmatpush3.bf16.msra.mxu1 %v779_v8  ;;  %p881_p2 = pnand %p880_p12, %p874_p3 }
  0x75   : > { %664 = vmatprep.subr.bf16.mxu0 %v948_v0  ;;  %684 = vmatprep.subr.bf16.mxu1 %v948_v0 }
  0x78   : > { %665 = vmatpush3.bf16.msra.mxu0 %v772_v5  ;;  %685 = vmatpush3.bf16.msra.mxu1 %v780_v10 }
  0x79   : > { %666 = vmatprep.subr.bf16.mxu0 %v948_v0  ;;  %686 = vmatprep.subr.bf16.mxu1 %v948_v0 }
  0x7c   : > { %667 = vmatpush3.bf16.msra.mxu0 %v773_v7  ;;  %687 = vmatpush3.bf16.msra.mxu1 %v781_v12 }
  0x7d   : > { %668 = vmatprep.subr.bf16.mxu0 %v948_v0  ;;  %688 = vmatprep.subr.bf16.mxu1 %v948_v0 }
  0x80   : > { %669 = vmatpush3.bf16.msra.mxu0 %v774_v9  ;;  %689 = vmatpush3.bf16.msra.mxu1 %v782_v15 }
  0x81   : > { %670 = vmatprep.subr.bf16.mxu0 %v948_v0  ;;  %690 = vmatprep.subr.bf16.mxu1 %v948_v0 }
  0x84   : > { %671 = vmatpush3.bf16.msra.mxu0 %v775_v11  ;;  %691 = vmatpush3.bf16.msra.mxu1 %v783_v17 }
  0x85   : > { %672 = vmatprep.subr.bf16.mxu0 %v948_v0  ;;  %692 = vmatprep.subr.bf16.mxu1 %v948_v0 }
  0x88   : > { %673 = vmatpush3.bf16.msra.mxu0 %v776_v13  ;;  %693 = vmatpush3.bf16.msra.mxu1 %v784_v18 }
  0x8b   : > { %675 = vmatmul.mubr.bf16.vlgmr.msra.gmra.mrb[0].mxu0 %v271_v16 }
 0x15e   : > { %v377_v20 = vpop.f32.mrb[0].mxu0 }
 0x15f   : > { %v378_v21 = vadd.f32 %v618_v19, %v377_v20  ;;  %v676_v22 = vpop.f32.mrb[1].mxu0 }
 0x160   : > { %v380_v23 = vpop.f32.mrb[2].mxu0 }
 0x161   : > { %vm383_vm1 = vcmp.gt.f32.partialorder %v378_v21, 0.0  ;;  %v384_v24 = vmul.f32 0.01, %v378_v21  ;;  %v677_v25 = vpop.f32.mrb[3].mxu0 }
 0x163   : > { %v385_v26 = vsel %vm383_vm1, %v378_v21, %v384_v24 }
 0x164   : > { %v386_v27 = vpack.c.bf16 %v385_v26, %v385_v26 }
 0x166   : > { %695 = vmatmul.mubr.bf16.vlgmr.msra.gmra.mrb[0].mxu1 %v386_v27 }
 0x239   : > { %v492_v29 = vpop.f32.mrb[0].mxu1 }
 0x23a   : > { %v493_v30 = vadd.f32 %v627_v28, %v492_v29  ;;  %v696_v31 = vpop.f32.mrb[1].mxu1 }
 0x23b   : > { %v495_v32 = vpop.f32.mrb[2].mxu1 }
 0x23c   : > { %v498_v33 = vadd.f32 %v493_v30, %v270_v14  ;;  %v697_v34 = vpop.f32.mrb[3].mxu1 }
 0x23e   : > { %vm499_vm2 = vcmp.gt.f32.partialorder %v498_v33, 0.0  ;;  %v500_v35 = vmul.f32 0.01, %v498_v33 }
 0x240   : > { %v501_v36 = vsel %vm499_vm2, %v498_v33, %v500_v35 }
 0x241   : > { %502 = vst [vmem:[%s268_s28] sm:$0xff] %v501_v36 }
 0x242   : > { %884 = shalt.err (!%p881_p2)
}
 0x243   : > { %s885_s12 = scalar_lea.hbm %s1179_s15, 128  ;;  %s889_s26 = scalar_lea.hbm %s1228_s5, 256 }
 0x244   : > { %p886_p13 = scmp.ne.s32.totalorder %s1179_s15, %s885_s12  ;;  %p890_p4 = scmp.lt.u32.totalorder %s1179_s15, %s1228_s5 }
 0x245   : > { %p891_p5 = scmp.lt.u32.totalorder %s889_s26, %s885_s12  ;;  %p893_p11 = scmp.lt.u32.totalorder %s885_s12, %s1179_s15 }
 0x246   : > { %p887_p6 = pnand %p886_p13, %p1242_p0 }
 0x247   : > { %p892_p8 = por %p891_p5, %p890_p4 }
 0x248   : > { %p888_p10 = pneg %p887_p6 }
 0x249   : > { %p894_p1 = por %p893_p11, %p892_p8 }
 0x24b   : > { %p895_p3 = pnand %p894_p1, %p888_p10 }
 0x24d   : > { %898 = shalt.err (!%p895_p3)
}
 0x24e   : > { %708 = dma.vmem_to_hbm [thread:$0]  (%p1242_p0), %s1181_s7, 128, %s1179_s15, %s504_s16  }
 0x24f PF: > { %s529_s11 = sand.u32 1, %s929_s18   ;;  %p1243_p7 = scmp.ne.s32.totalorder %s1233_s25, 0 }
 0x250   : > { %p1244_p9 = scmp.ge.s32.totalorder %s941_s21, 2  ;;  %s530_s28 = scalar_lea.sflag [#allocation4], %s529_s11 }
 0x252   : > { %p722_p12 = pnand %p1244_p9, %p1243_p7 }
 0x254   : > { %924 = dma.done.wait (!%p722_p12), %s530_s28, 128  }
 0x255   : > { %926 = vsyncadd (!%p722_p12), %s530_s28, 4294967168  ;;  %p19_p2 = scmp.ge.s32.totalorder %s1091_s14, 4   ;;  %s1245_s18 = smov %s933_s19 }
 0x256   : > { %s1246_s19 = smov %s937_s20  ;;  %s1247_s20 = smov %s1107_s27 }
 0x257   : > { %s1248_s21 = smov %s1091_s14  ;;  %21 = sbr.rel (!%p19_p2) target bundleno = 6 (0x6), region = 93 }
 0x25e   :  { %535 = vsyncpa [#allocation3], 1 }
 0x25f   :  { %537 = vsyncpa [#allocation3 + $0x1], 1 }
 0x260   :  { %538 = vsyncpa [#allocation6], 1 }
 0x261   :  { %539 = vsyncpa [#allocation4], 1 }
 0x262   :  { %541 = vsyncpa [#allocation4 + $0x1], 1 }

</bundles_post_ra>
